<compile_context>
chip_gen: v5e
topology: v5e:2x2
jax: 0.10.0
libtpu: 0.0.40
codegen_flags: <defaults>
</compile_context>

<pallas_src>
import jax
import jax.numpy as jnp
from jax.experimental import pallas as pl
from jax.experimental.pallas import tpu as pltpu

_IN = 784           # 28 * 28
_LANE = 128         # TPU lane width


def _autoencoder_kernel(x_ref,
                        w1_ref, b1_ref,
                        w2_ref, b2_ref,
                        w3_ref, b3_ref,
                        w4_ref, b4_ref,
                        out_ref):
    # x tile: [TB, 784] f32 straight from HBM (no separate wrapper cast pass);
    # cast to bf16 here for the MXU -- the VPU pack hides under the DMA.
    x = x_ref[...].astype(w1_ref.dtype)

    h = jnp.dot(x, w1_ref[...], preferred_element_type=jnp.float32)
    h = jnp.maximum(h + b1_ref[...], 0.0)                       # relu, [TB,128]

    h = jnp.dot(h.astype(w2_ref.dtype), w2_ref[...],
                preferred_element_type=jnp.float32)
    h = jnp.maximum(h + b2_ref[...], 0.0)                       # relu, [TB,128]

    h = jnp.dot(h.astype(w3_ref.dtype), w3_ref[...],
                preferred_element_type=jnp.float32)
    h = jnp.maximum(h + b3_ref[...], 0.0)                       # relu, [TB,128]

    h = jnp.dot(h.astype(w4_ref.dtype), w4_ref[...],
                preferred_element_type=jnp.float32)
    h = h + b4_ref[...]                                         # [TB, 784] f32
    # sigmoid(z) == 0.5 * (tanh(0.5 z) + 1): single EUP op, no divide.
    out_ref[...] = (0.5 * (jnp.tanh(0.5 * h) + 1.0)).astype(out_ref.dtype)


def _round_up(n, m):
    return (n + m - 1) // m * m


def _pad_to(a, shape):
    return jnp.pad(a, [(0, t - s) for s, t in zip(a.shape, shape)])


def _choose_batch_tile(B, batch_tile):
    """Pick a batch tile: multiple of 8, >=2 grid steps when B is large."""
    if B <= 16:
        return B                                   # one full-array block
    half = _round_up(pl.cdiv(B, 2), 8)             # force >=2 grid steps
    return min(_round_up(batch_tile, 8), half)


def nonlinear_autoencoder(x_nchw, params, *, reshape=True, batch_tile=1024,
                          compute_dtype=jnp.bfloat16,
                          out_dtype=jnp.bfloat16):
    """Forward pass matching NonlinearAutoencoder.forward.

    x_nchw: [B, 1, 28, 28] (reshape=True) or already [B, 784], float32.
    params: dict with w1..w4 shaped (in_features, out_features) and
            b1..b4 shaped (1, out_features), float32 (torch Linear transposed).
    """
    x = x_nchw.reshape(-1, _IN) if reshape else x_nchw
    B = x.shape[0]

    H = params["w2"].shape[1]
    Hp = _round_up(max(H, _LANE), _LANE)     # hidden_units -> 128-multiple
    H1 = _round_up(100, _LANE)               # 100 -> 128

    # Zero-pad hidden dims to lane multiples; cast MXU operands (weights) to
    # bf16.  Padding is inert: padded rows/cols and biases are zero, ReLU(0)=0.
    w1 = _pad_to(params["w1"], (_IN, H1)).astype(compute_dtype)
    b1 = _pad_to(params["b1"], (1, H1)).astype(jnp.float32)
    w2 = _pad_to(params["w2"], (H1, Hp)).astype(compute_dtype)
    b2 = _pad_to(params["b2"], (1, Hp)).astype(jnp.float32)
    w3 = _pad_to(params["w3"], (Hp, H1)).astype(compute_dtype)
    b3 = _pad_to(params["b3"], (1, H1)).astype(jnp.float32)
    w4 = _pad_to(params["w4"], (H1, _IN)).astype(compute_dtype)
    b4 = params["b4"].astype(jnp.float32)

    # Batch tiling.  No wrapper-side pad: the ragged last tile (if any) is
    # handled by Pallas non-divisible-grid masking; rows are independent so
    # padded-region garbage cannot contaminate valid rows.
    TB = _choose_batch_tile(B, batch_tile)
    grid = (pl.cdiv(B, TB),)

    def resident(a):
        # Whole-array block with a constant index_map: stays VMEM-resident
        # across grid steps (no re-DMA of weights/biases).
        return pl.BlockSpec(a.shape, lambda i: (0,) * a.ndim)

    weights = (w1, b1, w2, b2, w3, b3, w4, b4)

    out_itemsize = jnp.dtype(out_dtype).itemsize
    weight_bytes = sum(int(a.size) * a.dtype.itemsize for a in weights)
    cost = pl.CostEstimate(
        flops=2 * B * (_IN * H1 + H1 * Hp + Hp * H1 + H1 * _IN),
        transcendentals=B * _IN,                       # tanh on the output
        bytes_accessed=B * _IN * 4 + B * _IN * out_itemsize + weight_bytes,
    )

    out = pl.pallas_call(
        _autoencoder_kernel,
        out_shape=jax.ShapeDtypeStruct((B, _IN), out_dtype),
        grid=grid,
        in_specs=[pl.BlockSpec((TB, _IN), lambda i: (i, 0))]
                 + [resident(a) for a in weights],
        out_specs=pl.BlockSpec((TB, _IN), lambda i: (i, 0)),
        compiler_params=pltpu.CompilerParams(
            dimension_semantics=("parallel",),   # shard batch across TCs (v7x)
            vmem_limit_bytes=40 << 20,           # ~17-20 MiB working set @ TB=1024
        ),
        cost_estimate=cost,
    )(x, *weights)

    if reshape:
        out = out.reshape(-1, 1, 28, 28)
    return out


def init_params(key, hidden_units):
    """Deterministic init mimicking nn.Linear (uniform(+-1/sqrt(fan_in)))."""
    dims = [(784, 100), (100, hidden_units), (hidden_units, 100), (100, 784)]
    params = {}
    keys = jax.random.split(key, 2 * len(dims))
    for i, (fan_in, fan_out) in enumerate(dims):
        bound = 1.0 / jnp.sqrt(float(fan_in))
        params[f"w{i + 1}"] = jax.random.uniform(
            keys[2 * i], (fan_in, fan_out), minval=-bound, maxval=bound,
            dtype=jnp.float32)
        params[f"b{i + 1}"] = jax.random.uniform(
            keys[2 * i + 1], (1, fan_out), minval=-bound, maxval=bound,
            dtype=jnp.float32)
    return params


def _reference(x_nchw, params, reshape=True):
    """Pure-JAX f32 reference (mirrors the PyTorch forward)."""
    x = x_nchw.reshape(-1, _IN) if reshape else x_nchw
    h = jax.nn.relu(x @ params["w1"] + params["b1"])
    h = jax.nn.relu(h @ params["w2"] + params["b2"])
    h = jax.nn.relu(h @ params["w3"] + params["b3"])
    h = jax.nn.sigmoid(h @ params["w4"] + params["b4"])
    return h.reshape(-1, 1, 28, 28) if reshape else h


if __name__ == "__main__":
    key = jax.random.PRNGKey(0)
    k_params, k_x = jax.random.split(key)

    hidden_units = 32
    batch = 2

    params = init_params(k_params, hidden_units)
    x = jax.random.normal(k_x, (batch, 1, 28, 28), dtype=jnp.float32)

    y = nonlinear_autoencoder(x, params, reshape=True)
    y = jax.block_until_ready(y)

    assert y.shape == (batch, 1, 28, 28), y.shape
    assert y.dtype == jnp.bfloat16, y.dtype
    yf = y.astype(jnp.float32)
    # sigmoid output range sanity check
    assert bool(jnp.all(yf >= 0.0)) and bool(jnp.all(yf <= 1.0))

    # numerical check against f32 reference (loose tolerance: bf16 matmuls +
    # bf16 output rounding)
    y_ref = _reference(x, params, reshape=True)
    assert bool(jnp.max(jnp.abs(yf - y_ref)) < 5e-2), float(
        jnp.max(jnp.abs(yf - y_ref)))

    # also exercise a multi-tile, ragged-last-tile path
    x_big = jax.random.normal(jax.random.PRNGKey(1), (40, 1, 28, 28),
                              dtype=jnp.float32)
    y_big = jax.block_until_ready(
        nonlinear_autoencoder(x_big, params, batch_tile=16))
    y_big_ref = _reference(x_big, params)
    assert y_big.shape == (40, 1, 28, 28)
    assert bool(jnp.max(jnp.abs(y_big.astype(jnp.float32) - y_big_ref)) < 5e-2)

    print("KERNEL_OK")
</pallas_src>

<mosaic_0001>
module attributes {stable_mosaic.version = 11 : i64} {
  func.func @_autoencoder_kernel(%arg0: i32, %arg1: memref<2x784xf32, #tpu.memory_space<vmem>>, %arg2: memref<784x128xbf16, #tpu.memory_space<vmem>>, %arg3: memref<1x128xf32, #tpu.memory_space<vmem>>, %arg4: memref<128x128xbf16, #tpu.memory_space<vmem>>, %arg5: memref<1x128xf32, #tpu.memory_space<vmem>>, %arg6: memref<128x128xbf16, #tpu.memory_space<vmem>>, %arg7: memref<1x128xf32, #tpu.memory_space<vmem>>, %arg8: memref<128x784xbf16, #tpu.memory_space<vmem>>, %arg9: memref<1x784xf32, #tpu.memory_space<vmem>>, %arg10: memref<2x784xbf16, #tpu.memory_space<vmem>>) attributes {dimension_semantics = [#tpu.dimension_semantics<parallel>], iteration_bounds = array<i64: 1>, scalar_prefetch = 0 : i64, scratch_operands = 0 : i64, tpu.core_type = #tpu.core_type<tc>, window_params = [{transform_indices = @transform_0, window_bounds = array<i64: 2, 784>}, {pipeline_mode = #tpu.pipeline_mode<synchronous>, transform_indices = @transform_1, window_bounds = array<i64: 784, 128>}, {pipeline_mode = #tpu.pipeline_mode<synchronous>, transform_indices = @transform_2, window_bounds = array<i64: 1, 128>}, {pipeline_mode = #tpu.pipeline_mode<synchronous>, transform_indices = @transform_3, window_bounds = array<i64: 128, 128>}, {pipeline_mode = #tpu.pipeline_mode<synchronous>, transform_indices = @transform_4, window_bounds = array<i64: 1, 128>}, {pipeline_mode = #tpu.pipeline_mode<synchronous>, transform_indices = @transform_5, window_bounds = array<i64: 128, 128>}, {pipeline_mode = #tpu.pipeline_mode<synchronous>, transform_indices = @transform_6, window_bounds = array<i64: 1, 128>}, {pipeline_mode = #tpu.pipeline_mode<synchronous>, transform_indices = @transform_7, window_bounds = array<i64: 128, 784>}, {pipeline_mode = #tpu.pipeline_mode<synchronous>, transform_indices = @transform_8, window_bounds = array<i64: 1, 784>}, {transform_indices = @transform_9, window_bounds = array<i64: 2, 784>}]} {
    %c0 = arith.constant 0 : index
    %c0_0 = arith.constant 0 : index
    %0 = vector.load %arg1[%c0, %c0_0] : memref<2x784xf32, #tpu.memory_space<vmem>>, vector<2x784xf32>
    %1 = arith.truncf %0 : vector<2x784xf32> to vector<2x784xbf16>
    %c0_1 = arith.constant 0 : index
    %c0_2 = arith.constant 0 : index
    %2 = vector.load %arg2[%c0_1, %c0_2] : memref<784x128xbf16, #tpu.memory_space<vmem>>, vector<784x128xbf16>
    %cst = arith.constant dense<0.000000e+00> : vector<2x128xf32>
    %3 = tpu.matmul %1, %2, %cst {dimension_numbers = #tpu.dot_dimension_numbers<[1], [0], [0], [1], [0, 0, 1, 1], [], []>} : vector<2x784xbf16>, vector<784x128xbf16>, vector<2x128xf32> -> vector<2x128xf32>
    %c0_3 = arith.constant 0 : index
    %c0_4 = arith.constant 0 : index
    %4 = vector.load %arg3[%c0_3, %c0_4] : memref<1x128xf32, #tpu.memory_space<vmem>>, vector<1x128xf32>
    %5 = vector.broadcast %4 : vector<1x128xf32> to vector<2x128xf32>
    %6 = arith.addf %3, %5 : vector<2x128xf32>
    %cst_5 = arith.constant 0.000000e+00 : f32
    %7 = vector.broadcast %cst_5 : f32 to vector<2x128xf32>
    %8 = arith.maximumf %6, %7 : vector<2x128xf32>
    %9 = arith.truncf %8 : vector<2x128xf32> to vector<2x128xbf16>
    %c0_6 = arith.constant 0 : index
    %c0_7 = arith.constant 0 : index
    %10 = vector.load %arg4[%c0_6, %c0_7] : memref<128x128xbf16, #tpu.memory_space<vmem>>, vector<128x128xbf16>
    %cst_8 = arith.constant dense<0.000000e+00> : vector<2x128xf32>
    %11 = tpu.matmul %9, %10, %cst_8 {dimension_numbers = #tpu.dot_dimension_numbers<[1], [0], [0], [1], [0, 0, 1, 1], [], []>} : vector<2x128xbf16>, vector<128x128xbf16>, vector<2x128xf32> -> vector<2x128xf32>
    %c0_9 = arith.constant 0 : index
    %c0_10 = arith.constant 0 : index
    %12 = vector.load %arg5[%c0_9, %c0_10] : memref<1x128xf32, #tpu.memory_space<vmem>>, vector<1x128xf32>
    %13 = vector.broadcast %12 : vector<1x128xf32> to vector<2x128xf32>
    %14 = arith.addf %11, %13 : vector<2x128xf32>
    %cst_11 = arith.constant 0.000000e+00 : f32
    %15 = vector.broadcast %cst_11 : f32 to vector<2x128xf32>
    %16 = arith.maximumf %14, %15 : vector<2x128xf32>
    %17 = arith.truncf %16 : vector<2x128xf32> to vector<2x128xbf16>
    %c0_12 = arith.constant 0 : index
    %c0_13 = arith.constant 0 : index
    %18 = vector.load %arg6[%c0_12, %c0_13] : memref<128x128xbf16, #tpu.memory_space<vmem>>, vector<128x128xbf16>
    %cst_14 = arith.constant dense<0.000000e+00> : vector<2x128xf32>
    %19 = tpu.matmul %17, %18, %cst_14 {dimension_numbers = #tpu.dot_dimension_numbers<[1], [0], [0], [1], [0, 0, 1, 1], [], []>} : vector<2x128xbf16>, vector<128x128xbf16>, vector<2x128xf32> -> vector<2x128xf32>
    %c0_15 = arith.constant 0 : index
    %c0_16 = arith.constant 0 : index
    %20 = vector.load %arg7[%c0_15, %c0_16] : memref<1x128xf32, #tpu.memory_space<vmem>>, vector<1x128xf32>
    %21 = vector.broadcast %20 : vector<1x128xf32> to vector<2x128xf32>
    %22 = arith.addf %19, %21 : vector<2x128xf32>
    %cst_17 = arith.constant 0.000000e+00 : f32
    %23 = vector.broadcast %cst_17 : f32 to vector<2x128xf32>
    %24 = arith.maximumf %22, %23 : vector<2x128xf32>
    %25 = arith.truncf %24 : vector<2x128xf32> to vector<2x128xbf16>
    %c0_18 = arith.constant 0 : index
    %c0_19 = arith.constant 0 : index
    %26 = vector.load %arg8[%c0_18, %c0_19] : memref<128x784xbf16, #tpu.memory_space<vmem>>, vector<128x784xbf16>
    %cst_20 = arith.constant dense<0.000000e+00> : vector<2x784xf32>
    %27 = tpu.matmul %25, %26, %cst_20 {dimension_numbers = #tpu.dot_dimension_numbers<[1], [0], [0], [1], [0, 0, 1, 1], [], []>} : vector<2x128xbf16>, vector<128x784xbf16>, vector<2x784xf32> -> vector<2x784xf32>
    %c0_21 = arith.constant 0 : index
    %c0_22 = arith.constant 0 : index
    %28 = vector.load %arg9[%c0_21, %c0_22] : memref<1x784xf32, #tpu.memory_space<vmem>>, vector<1x784xf32>
    %29 = vector.broadcast %28 : vector<1x784xf32> to vector<2x784xf32>
    %30 = arith.addf %27, %29 : vector<2x784xf32>
    %cst_23 = arith.constant 5.000000e-01 : f32
    %31 = vector.broadcast %cst_23 : f32 to vector<2x784xf32>
    %32 = arith.mulf %31, %30 : vector<2x784xf32>
    %33 = math.tanh %32 : vector<2x784xf32>
    %cst_24 = arith.constant 1.000000e+00 : f32
    %34 = vector.broadcast %cst_24 : f32 to vector<2x784xf32>
    %35 = arith.addf %33, %34 : vector<2x784xf32>
    %cst_25 = arith.constant 5.000000e-01 : f32
    %36 = vector.broadcast %cst_25 : f32 to vector<2x784xf32>
    %37 = arith.mulf %36, %35 : vector<2x784xf32>
    %38 = arith.truncf %37 : vector<2x784xf32> to vector<2x784xbf16>
    %c0_26 = arith.constant 0 : index
    %c0_27 = arith.constant 0 : index
    %39 = vector.load %arg10[%c0_26, %c0_27] : memref<2x784xbf16, #tpu.memory_space<vmem>>, vector<2x784xbf16>
    tpu.vector_store %arg10[%c0_26, %c0_27], %38 {strides = array<i32>} : memref<2x784xbf16, #tpu.memory_space<vmem>>, vector<2x784xbf16>,
    return
  }
  func.func @transform_0(%arg0: i32) -> (i32, i32) {
    %c0_i32 = arith.constant 0 : i32
    %c0_i32_0 = arith.constant 0 : i32
    return %arg0, %c0_i32 : i32, i32
  }
  func.func @transform_1(%arg0: i32) -> (i32, i32) {
    %c0_i32 = arith.constant 0 : i32
    %c0_i32_0 = arith.constant 0 : i32
    %c0_i32_1 = arith.constant 0 : i32
    return %c0_i32, %c0_i32_0 : i32, i32
  }
  func.func @transform_2(%arg0: i32) -> (i32, i32) {
    %c0_i32 = arith.constant 0 : i32
    %c0_i32_0 = arith.constant 0 : i32
    %c0_i32_1 = arith.constant 0 : i32
    return %c0_i32, %c0_i32_0 : i32, i32
  }
  func.func @transform_3(%arg0: i32) -> (i32, i32) {
    %c0_i32 = arith.constant 0 : i32
    %c0_i32_0 = arith.constant 0 : i32
    %c0_i32_1 = arith.constant 0 : i32
    return %c0_i32, %c0_i32_0 : i32, i32
  }
  func.func @transform_4(%arg0: i32) -> (i32, i32) {
    %c0_i32 = arith.constant 0 : i32
    %c0_i32_0 = arith.constant 0 : i32
    %c0_i32_1 = arith.constant 0 : i32
    return %c0_i32, %c0_i32_0 : i32, i32
  }
  func.func @transform_5(%arg0: i32) -> (i32, i32) {
    %c0_i32 = arith.constant 0 : i32
    %c0_i32_0 = arith.constant 0 : i32
    %c0_i32_1 = arith.constant 0 : i32
    return %c0_i32, %c0_i32_0 : i32, i32
  }
  func.func @transform_6(%arg0: i32) -> (i32, i32) {
    %c0_i32 = arith.constant 0 : i32
    %c0_i32_0 = arith.constant 0 : i32
    %c0_i32_1 = arith.constant 0 : i32
    return %c0_i32, %c0_i32_0 : i32, i32
  }
  func.func @transform_7(%arg0: i32) -> (i32, i32) {
    %c0_i32 = arith.constant 0 : i32
    %c0_i32_0 = arith.constant 0 : i32
    %c0_i32_1 = arith.constant 0 : i32
    return %c0_i32, %c0_i32_0 : i32, i32
  }
  func.func @transform_8(%arg0: i32) -> (i32, i32) {
    %c0_i32 = arith.constant 0 : i32
    %c0_i32_0 = arith.constant 0 : i32
    %c0_i32_1 = arith.constant 0 : i32
    return %c0_i32, %c0_i32_0 : i32, i32
  }
  func.func @transform_9(%arg0: i32) -> (i32, i32) {
    %c0_i32 = arith.constant 0 : i32
    %c0_i32_0 = arith.constant 0 : i32
    return %arg0, %c0_i32 : i32, i32
  }
}

</mosaic_0001>

<bundles_post_ra>
// kernel: tpu_custom_call.1
= control target key start
LH: loop header
LB: loop body
LE: loop exit
PB: predicated region body
PF: predicated region fallthrough
CT: control target
= control target key end

     0   :  { %s2533_s0 = inlined_call_operand.vmem [shape: f32[2,784], index: 0, kind: input, shape index: {}]   ;;  %s2534_s1 = inlined_call_operand.vmem [shape: bf16[784,128], index: 1, kind: input, shape index: {}]   ;;  %s2535_s2 = inlined_call_operand.vmem [shape: f32[1,128], index: 2, kind: input, shape index: {}]   ;;  %s2536_s3 = inlined_call_operand.vmem [shape: bf16[128,128], index: 3, kind: input, shape index: {}]   ;;  %s2537_s4 = inlined_call_operand.vmem [shape: f32[1,128], index: 4, kind: input, shape index: {}]   ;;  %s2538_s5 = inlined_call_operand.vmem [shape: bf16[128,128], index: 5, kind: input, shape index: {}]   ;;  %s2539_s6 = inlined_call_operand.vmem [shape: f32[1,128], index: 6, kind: input, shape index: {}]   ;;  %s2540_s7 = inlined_call_operand.vmem [shape: bf16[128,784], index: 7, kind: input, shape index: {}]   ;;  %s2541_s8 = inlined_call_operand.vmem [shape: f32[1,784], index: 8, kind: input, shape index: {}]   ;;  %s2542_s9 = inlined_call_operand.hbm [shape: bf16[2,784], index: 9, kind: output, shape index: {}]  }
   0x1   :  { %v1765_v0 = vld [vmem:[%s2534_s1 + $0x38] sm:$0xff]  ;;  %v1764_v3 = vld [vmem:[%s2534_s1 + $0x30] sm:$0xff]  ;;  %v1763_v8 = vld [vmem:[%s2534_s1 + $0x28] sm:$0xff] }
   0x2   :  { %v1773_v1 = vld [vmem:[%s2534_s1 + $0x78] sm:$0xff]  ;;  %462 = vmatpush.bf16.msra.mxu0 %v1765_v0  ;;  %v1772_v4 = vld [vmem:[%s2534_s1 + $0x70] sm:$0xff]  ;;  %v1771_v9 = vld [vmem:[%s2534_s1 + $0x68] sm:$0xff] }
   0x3   :  { %v1781_v2 = vld [vmem:[%s2534_s1 + $0xb8] sm:$0xff]  ;;  %475 = vmatpush.bf16.msra.mxu1 %v1773_v1  ;;  %v1780_v5 = vld [vmem:[%s2534_s1 + $0xb0] sm:$0xff]  ;;  %v1779_v10 = vld [vmem:[%s2534_s1 + $0xa8] sm:$0xff] }
   0x4   :  { %488 = vmatpush.bf16.msra.mxu2 %v1781_v2  ;;  %v1789_v6 = vld [vmem:[%s2534_s1 + $0xf8] sm:$0xff]  ;;  %v1788_v7 = vld [vmem:[%s2534_s1 + $0xf0] sm:$0xff]  ;;  %v1787_v11 = vld [vmem:[%s2534_s1 + $0xe8] sm:$0xff] }
   0x5   :  { %501 = vmatpush.bf16.msra.mxu3 %v1789_v6  ;;  %v1762_v12 = vld [vmem:[%s2534_s1 + $0x20] sm:$0xff]  ;;  %v1761_v17 = vld [vmem:[%s2534_s1 + $0x18] sm:$0xff]  ;;  %v35_v19 = vld [vmem:[%s2533_s0 + $0x8] sm:$0x3f] }
   0x6   :  { %463 = vmatpush.bf16.msra.mxu0 %v1764_v3  ;;  %v1770_v13 = vld [vmem:[%s2534_s1 + $0x60] sm:$0xff]  ;;  %v1769_v18 = vld [vmem:[%s2534_s1 + $0x58] sm:$0xff]  ;;  %40 = vst [vmem:[#allocation1 + $0x20] ss:$4 sm:$0xff] %v35_v19 }
   0x7   :  { %476 = vmatpush.bf16.msra.mxu1 %v1772_v4  ;;  %v1778_v14 = vld [vmem:[%s2534_s1 + $0xa0] sm:$0xff]  ;;  %v1777_v20 = vld [vmem:[%s2534_s1 + $0x98] sm:$0xff] }
   0x8   :  { %489 = vmatpush.bf16.msra.mxu2 %v1780_v5  ;;  %v34_v15 = vld [vmem:[%s2533_s0] sm:$0xff] }
   0x9   :  { %502 = vmatpush.bf16.msra.mxu3 %v1788_v7  ;;  %38 = vst [vmem:[#allocation1] ss:$4 sm:$0xff] %v34_v15  ;;  %v1786_v16 = vld [vmem:[%s2534_s1 + $0xe0] sm:$0xff] }
   0xa   :  { %464 = vmatpush.bf16.msra.mxu0 %v1763_v8 }
   0xb   :  { %477 = vmatpush.bf16.msra.mxu1 %v1771_v9 }
   0xc   :  { %490 = vmatpush.bf16.msra.mxu2 %v1779_v10 }
   0xd   :  { %503 = vmatpush.bf16.msra.mxu3 %v1787_v11 }
   0xe   :  { %465 = vmatpush.bf16.msra.mxu0 %v1762_v12 }
   0xf   :  { %478 = vmatpush.bf16.msra.mxu1 %v1770_v13 }
  0x10   :  { %491 = vmatpush.bf16.msra.mxu2 %v1778_v14 }
  0x11   :  { %14 = vsyncpa [#allocation3], 0  ;;  %504 = vmatpush.bf16.msra.mxu3 %v1786_v16  ;;  %v1785_v21 = vld [vmem:[%s2534_s1 + $0xd8] sm:$0xff]  ;;  %v1760_v22 = vld [vmem:[%s2534_s1 + $0x10] sm:$0xff]  ;;  %vm458_vm0 = vcmask 130048   ;;  %vm1246_vm1 = vcmask 1041409  }
  0x12   :  { %466 = vmatpush.bf16.msra.mxu0 %v1761_v17  ;;  %v1768_v23 = vld [vmem:[%s2534_s1 + $0x50] sm:$0xff]  ;;  %v1759_v26 = vld [vmem:[%s2534_s1 + $0x8] sm:$0xff]  ;;  %v1758_v29 = vld [vmem:[%s2534_s1] sm:$0xff]  ;;  %vm1223_vm2 = vcmask 1040384   ;;  %vm1227_vm4 = vcmask 1042434   ;;  %vm1249_vm5 = vcmask 1043459  }
  0x13   :  { %479 = vmatpush.bf16.msra.mxu1 %v1769_v18  ;;  %v1776_v24 = vld [vmem:[%s2534_s1 + $0x90] sm:$0xff]  ;;  %v1767_v27 = vld [vmem:[%s2534_s1 + $0x48] sm:$0xff]  ;;  %v1766_v30 = vld [vmem:[%s2534_s1 + $0x40] sm:$0xff]  ;;  %vm1233_vm8 = vcmask 1044484   ;;  %vm1252_vm10 = vcmask 1045509   ;;  %vm1231_vm11 = vcmask 1041408  }
  0x14   :  { %492 = vmatpush.bf16.msra.mxu2 %v1777_v20  ;;  %v1784_v25 = vld [vmem:[%s2534_s1 + $0xd0] sm:$0xff]  ;;  %v1775_v28 = vld [vmem:[%s2534_s1 + $0x88] sm:$0xff]  ;;  %v41_v32 = vld.sshfl [vmem:[#allocation1] sm:$0xff pattern:$0x73625140]  ;;  %vm1237_vm12 = vcmask 1046534  }
  0x15   :  { %505 = vmatpush.bf16.msra.mxu3 %v1785_v21  ;;  %v1783_v31 = vld [vmem:[%s2534_s1 + $0xc8] sm:$0xff]  ;;  %v1797_v34 = vld [vmem:[%s2534_s1 + $0x138] sm:$0xff]  ;;  %v1774_v36 = vld [vmem:[%s2534_s1 + $0x80] sm:$0xff]  ;;  %v55_v38 = vpack.c.bf16 %v41_v32, %v41_v32  ;;  %vm1254_vm14 = vcmask 129030   ;;  %vm1241_vm15 = vcmask 1045508  }
  0x16   :  { %467 = vmatpush.bf16.msra.mxu0 %v1760_v22  ;;  %v42_v33 = vld.sshfl [vmem:[#allocation1 + $0x8] sm:$0xff pattern:$0x73625140]  ;;  %v1805_v35 = vld [vmem:[%s2534_s1 + $0x178] sm:$0xff]  ;;  %v1782_v40 = vld [vmem:[%s2534_s1 + $0xc0] sm:$0xff] }
  0x17   :  { %480 = vmatpush.bf16.msra.mxu1 %v1768_v23  ;;  %v43_v37 = vld.sshfl [vmem:[#allocation1 + $0x10] sm:$0xff pattern:$0x73625140]  ;;  %v56_v39 = vpack.c.bf16 %v42_v33, %v42_v33  ;;  %v1806_v41 = vld [vmem:[%s2534_s1 + $0x180] sm:$0xff]  ;;  %v1795_v47 = vld [vmem:[%s2534_s1 + $0x128] sm:$0xff] }
  0x18   :  { %493 = vmatpush.bf16.msra.mxu2 %v1776_v24  ;;  %v44_v42 = vld.sshfl [vmem:[#allocation1 + $0x18] sm:$0xff pattern:$0x73625140]  ;;  %v1796_v43 = vld [vmem:[%s2534_s1 + $0x130] sm:$0xff]  ;;  %v57_v45 = vpack.c.bf16 %v43_v37, %v43_v37  ;;  %v1803_v48 = vld [vmem:[%s2534_s1 + $0x168] sm:$0xff] }
  0x19   :  { %506 = vmatpush.bf16.msra.mxu3 %v1784_v25  ;;  %v1804_v44 = vld [vmem:[%s2534_s1 + $0x170] sm:$0xff]  ;;  %v58_v46 = vpack.c.bf16 %v44_v42, %v44_v42  ;;  %v1794_v49 = vld [vmem:[%s2534_s1 + $0x120] sm:$0xff]  ;;  %v1793_v51 = vld [vmem:[%s2534_s1 + $0x118] sm:$0xff] }
  0x1a   :  { %468 = vmatpush.bf16.msra.mxu0 %v1759_v26  ;;  %v1802_v50 = vld [vmem:[%s2534_s1 + $0x160] sm:$0xff]  ;;  %v1801_v52 = vld [vmem:[%s2534_s1 + $0x158] sm:$0xff]  ;;  %v47_v53 = vld.sshfl [vmem:[#allocation1 + $0x30] sm:$0xff pattern:$0x73625140] }
  0x1b   :  { %481 = vmatpush.bf16.msra.mxu1 %v1767_v27  ;;  %v1792_v54 = vld [vmem:[%s2534_s1 + $0x110] sm:$0xff]  ;;  %v61_v56 = vpack.c.bf16 %v47_v53, %v47_v53  ;;  %v1791_v57 = vld [vmem:[%s2534_s1 + $0x108] sm:$0xff]  ;;  %v1790_v59 = vld [vmem:[%s2534_s1 + $0x100] sm:$0xff] }
  0x1c   :  { %494 = vmatpush.bf16.msra.mxu2 %v1775_v28  ;;  %v1800_v55 = vld [vmem:[%s2534_s1 + $0x150] sm:$0xff]  ;;  %v1799_v58 = vld [vmem:[%s2534_s1 + $0x148] sm:$0xff]  ;;  %v1798_v60 = vld [vmem:[%s2534_s1 + $0x140] sm:$0xff] }
  0x1d   :  { %507 = vmatpush.bf16.msra.mxu3 %v1783_v31  ;;  %v45_v61 = vld.sshfl [vmem:[#allocation1 + $0x20] sm:$0xff pattern:$0x73625140]  ;;  %v46_v62 = vld.sshfl [vmem:[#allocation1 + $0x28] sm:$0xff pattern:$0x73625140]  ;;  %vm1247_vm3 = vmor %vm1246_vm1, %vm1223_vm2 }
  0x1e   :  { %469 = vmatpush.bf16.msra.mxu0 %v1758_v29  ;;  %v59_v63 = vpack.c.bf16 %v45_v61, %v45_v61  ;;  %v60_v0 = vpack.c.bf16 %v46_v62, %v46_v62  ;;  %v1814_v1 = vld [vmem:[%s2536_s3 + $0x38] sm:$0xff]  ;;  %v1813_v2 = vld [vmem:[%s2536_s3 + $0x30] sm:$0xff]  ;;  %v1812_v3 = vld [vmem:[%s2536_s3 + $0x28] sm:$0xff] }
  0x1f   :  { %482 = vmatpush.bf16.msra.mxu1 %v1766_v30  ;;  %v1811_v4 = vld [vmem:[%s2536_s3 + $0x20] sm:$0xff]  ;;  %v1810_v5 = vld [vmem:[%s2536_s3 + $0x18] sm:$0xff]  ;;  %v1809_v6 = vld [vmem:[%s2536_s3 + $0x10] sm:$0xff] }
  0x20   :  { %495 = vmatpush.bf16.msra.mxu2 %v1774_v36  ;;  %v1808_v7 = vld [vmem:[%s2536_s3 + $0x8] sm:$0xff]  ;;  %v1807_v10 = vld [vmem:[%s2536_s3] sm:$0xff]  ;;  %v1822_v13 = vld [vmem:[%s2538_s5 + $0x38] sm:$0xff] }
  0x21   :  { %470 = vmatmul.bf16.vlgmr.msra.gmra.mxu0 %v55_v38  ;;  %508 = vmatpush.bf16.msra.mxu3 %v1782_v40  ;;  %v1821_v16 = vld [vmem:[%s2538_s5 + $0x30] sm:$0xff]  ;;  %v1880_v17 = vld [vmem:[%s2535_s2] ss:$0 sm:$0xff]  ;;  %v1820_v18 = vld [vmem:[%s2538_s5 + $0x28] sm:$0xff] }
  0x22   :  { %514 = vmatpush.bf16.msrb.mxu0 %v1797_v34  ;;  %483 = vmatmul.bf16.vlgmr.msra.gmra.mxu1 %v56_v39  ;;  %v1819_v22 = vld [vmem:[%s2538_s5 + $0x20] sm:$0xff]  ;;  %v1818_v24 = vld [vmem:[%s2538_s5 + $0x18] sm:$0xff]  ;;  %v1817_v27 = vld [vmem:[%s2538_s5 + $0x10] sm:$0xff] }
  0x23   :  { %527 = vmatpush.bf16.msrb.mxu1 %v1805_v35  ;;  %496 = vmatmul.bf16.vlgmr.msra.gmra.mxu2 %v57_v45  ;;  %v1816_v39 = vld [vmem:[%s2538_s5 + $0x8] sm:$0xff]  ;;  %v1815_v40 = vld [vmem:[%s2538_s5] sm:$0xff]  ;;  %v1858_v61 = vld [vmem:[%s2540_s7 + $0x11c] sm:$0xf] }
  0x24   :  { %547 = vmatpush.bf16.msrb.mxu2 %v1806_v41  ;;  %509 = vmatmul.bf16.vlgmr.msra.gmra.mxu3 %v58_v46  ;;  %v1732_v41 = vld [vmem:[%s2540_s7 + $0x188] sm:$0xf]  ;;  %v1875_v42 = vld [vmem:[%s2540_s7 + $0x1a0] sm:$0xf0]  ;;  %v1740_v46 = vld [vmem:[%s2540_s7 + $0x190] sm:$0xf] }
  0x25   :  { %623 = vmatpush.bf16.msrb.mxu3 %v1814_v1  ;;  %v1734_v45 = vld [vmem:[%s2540_s7 + $0x1a4] sm:$0xf0]  ;;  %v1678_v62 = vld [vmem:[%s2540_s7 + $0x134] sm:$0xf0]  ;;  %vm1248_vm6 = vmor %vm1227_vm4, %vm1247_vm3 }
  0x26   :  { %515 = vmatpush.bf16.msrb.mxu0 %v1796_v43  ;;  %v1872_v43 = vld [vmem:[%s2540_s7 + $0x18c] sm:$0xf]  ;;  %vm1250_vm7 = vmor %vm1249_vm5, %vm1248_vm6 }
  0x27   :  { %528 = vmatpush.bf16.msrb.mxu1 %v1804_v44  ;;  %v1733_v44 = vor.u32 %v1875_v42, %v1732_v41  ;;  %v1564_v41 = vld [vmem:[%s2540_s7 + $0x38] sm:$0xf]  ;;  %v1833_v42 = vld [vmem:[%s2540_s7 + $0x50] sm:$0xf0]  ;;  %vm1251_vm9 = vmor %vm1233_vm8, %vm1250_vm7 }
  0x28   :  { %706 = vmatpush.bf16.msra.mxu2 %v1822_v13  ;;  %v1866_v13 = vld [vmem:[%s2540_s7 + $0x15c] sm:$0xf]  ;;  %vm1253_vm13 = vmor %vm1252_vm10, %vm1251_vm9 }
  0x29   :  { %624 = vmatpush.bf16.msrb.mxu3 %v1813_v2  ;;  %v1648_v2 = vld [vmem:[%s2540_s7 + $0xe0] sm:$0xf]  ;;  %vm1255_vm1 = vmor %vm1254_vm14, %vm1253_vm13 }
  0x2a   :  { %516 = vmatpush.bf16.msrb.mxu0 %v1795_v47  ;;  %v1876_v47 = vld [vmem:[%s2540_s7 + $0x1a8] sm:$0xf0] }
  0x2b   :  { %529 = vmatpush.bf16.msrb.mxu1 %v1803_v48  ;;  %v1737_v48 = vor.u32 %v1872_v43, %v1734_v45 }
  0x2c   :  { %707 = vmatpush.bf16.msra.mxu2 %v1821_v16  ;;  %v1847_v16 = vld [vmem:[%s2540_s7 + $0xc0] sm:$0xf0] }
  0x2d   :  { %625 = vmatpush.bf16.msrb.mxu3 %v1812_v3  ;;  %v1854_v3 = vld [vmem:[%s2540_s7 + $0xf8] sm:$0xf0] }
  0x2e   :  { %517 = vmatpush.bf16.msrb.mxu0 %v1794_v49  ;;  %v1741_v49 = vor.u32 %v1876_v47, %v1740_v46  ;;  %v1830_v46 = vld [vmem:[%s2540_s7 + $0x3c] sm:$0xf]  ;;  %v1845_v47 = vld [vmem:[%s2540_s7 + $0xb4] sm:$0xf] }
  0x2f   :  { %530 = vmatpush.bf16.msrb.mxu1 %v1802_v50  ;;  %v1704_v50 = vld [vmem:[%s2540_s7 + $0x150] sm:$0xf] }
  0x30   :  { %708 = vmatpush.bf16.msra.mxu2 %v1820_v18 }
  0x31   :  { %626 = vmatpush.bf16.msrb.mxu3 %v1811_v4  ;;  %v1681_v4 = vor.u32 %v1858_v61, %v1678_v62  ;;  %v1544_v61 = vld [vmem:[%s2540_s7 + $0x8] sm:$0xf]  ;;  %v1827_v62 = vld [vmem:[%s2540_s7 + $0x20] sm:$0xf0] }
  0x32   :  { %518 = vmatpush.bf16.msrb.mxu0 %v1793_v51  ;;  %v1868_v51 = vld [vmem:[%s2540_s7 + $0x168] sm:$0xf0] }
  0x33   :  { %531 = vmatpush.bf16.msrb.mxu1 %v1801_v52  ;;  %1469 = vmatmul.msk.bf16.vlgmr.msrb.gmra.mxu2 %vm458_vm0, %v61_v56  ;;  %v1865_v52 = vld [vmem:[%s2540_s7 + $0x154] sm:$0xf]  ;;  %v1705_v53 = vor.u32 %v1868_v51, %v1704_v50  ;;  %v1572_v50 = vld [vmem:[%s2540_s7 + $0x40] sm:$0xf]  ;;  %v1834_v51 = vld [vmem:[%s2540_s7 + $0x58] sm:$0xf0] }
  0x34   :  { %709 = vmatpush.bf16.msra.mxu2 %v1819_v22  ;;  %v1869_v56 = vld [vmem:[%s2540_s7 + $0x170] sm:$0xf0]  ;;  %v1628_v22 = vld [vmem:[%s2540_s7 + $0xb0] sm:$0xf]  ;;  %vm1243_vm0 = vcmask 1043456  }
  0x35   :  { %627 = vmatpush.bf16.msrb.mxu3 %v1810_v5 }
  0x36   :  { %519 = vmatpush.bf16.msrb.mxu0 %v1792_v54  ;;  %v1706_v54 = vld [vmem:[%s2540_s7 + $0x16c] sm:$0xf0] }
  0x37   :  { %532 = vmatpush.bf16.msrb.mxu1 %v1800_v55  ;;  %v1712_v55 = vld [vmem:[%s2540_s7 + $0x158] sm:$0xf] }
  0x38   :  { %710 = vmatpush.bf16.msra.mxu2 %v1818_v24  ;;  %v1848_v24 = vld [vmem:[%s2540_s7 + $0xc8] sm:$0xf0] }
  0x39   :  { %628 = vmatpush.bf16.msrb.mxu3 %v1809_v6  ;;  %v1851_v6 = vld [vmem:[%s2540_s7 + $0xe4] sm:$0xf] }
  0x3a   :  { %520 = vmatpush.bf16.msrb.mxu0 %v1791_v57  ;;  %v1709_v57 = vor.u32 %v1865_v52, %v1706_v54  ;;  %v1565_v52 = vor.u32 %v1833_v42, %v1564_v41  ;;  %v1826_v54 = vld [vmem:[%s2540_s7 + $0x18] sm:$0xf0]  ;;  %v1664_v41 = vld [vmem:[%s2540_s7 + $0xf0] sm:$0xf] }
  0x3b   :  { %533 = vmatpush.bf16.msrb.mxu1 %v1799_v58  ;;  %v1713_v58 = vor.u32 %v1869_v56, %v1712_v55  ;;  %v1823_v55 = vld [vmem:[%s2540_s7 + $0x4] sm:$0xf] }
  0x3c   :  { %711 = vmatpush.bf16.msra.mxu2 %v1817_v27 }
  0x3d   :  { %629 = vmatpush.bf16.msrb.mxu3 %v1808_v7  ;;  %v1873_v7 = vld [vmem:[%s2540_s7 + $0x194] sm:$0xf] }
  0x3e   :  { %521 = vmatpush.bf16.msrb.mxu0 %v1790_v59  ;;  %v1676_v59 = vld [vmem:[%s2540_s7 + $0x118] sm:$0xf] }
  0x3f   :  { %534 = vmatpush.bf16.msrb.mxu1 %v1798_v60  ;;  %v1861_v60 = vld [vmem:[%s2540_s7 + $0x130] sm:$0xf0] }
  0x40   :  { %712 = vmatpush.bf16.msra.mxu2 %v1816_v39  ;;  %v1677_v1 = vor.u32 %v1861_v60, %v1676_v59  ;;  %v1881_v39 = vld [vmem:[%s2537_s4] ss:$0 sm:$0xff]  ;;  %v1573_v59 = vor.u32 %v1834_v51, %v1572_v50  ;;  %v1636_v51 = vld [vmem:[%s2540_s7 + $0xb8] sm:$0xf]  ;;  %s1264_s4 = sshll.u32 %s2542_s9, 4  ;;  %s1265_s4 = int_to_ptr.hbm [resolvable:$true] %s1264_s4 }
  0x41   :  { %522 = vmatmul.bf16.vlgmr.msrb.gmra.mxu0 %v59_v63  ;;  %630 = vmatpush.bf16.msrb.mxu3 %v1807_v10  ;;  %v1684_v63 = vld [vmem:[%s2540_s7 + $0x120] sm:$0xf]  ;;  %v1656_v10 = vld [vmem:[%s2540_s7 + $0xe8] sm:$0xf] }
  0x42   :  { %535 = vmatmul.bf16.vlgmr.msrb.gmra.mxu1 %v60_v0  ;;  %1089 = vmatpush.bf16.msra.mxu0 %v1733_v44  ;;  %v1862_v0 = vld [vmem:[%s2540_s7 + $0x138] sm:$0xf0]  ;;  %v1538_v60 = vld [vmem:[%s2540_s7 + $0x1c] sm:$0xf0] }
  0x43   :  { %1102 = vmatpush.bf16.msra.mxu1 %v1737_v48  ;;  %v1685_v5 = vor.u32 %v1862_v0, %v1684_v63  ;;  %v1630_v48 = vld [vmem:[%s2540_s7 + $0xcc] sm:$0xf0]  ;;  %v1748_v0 = vld [vmem:[%s2540_s7 + $0x198] sm:$0xf] }
  0x44   :  { %713 = vmatpush.bf16.msra.mxu2 %v1815_v40  ;;  %v1633_v56 = vor.u32 %v1845_v47, %v1630_v48  ;;  %v1672_v48 = vld [vmem:[%s2540_s7 + $0xf8] sm:$0xf] }
  0x45   :  { %1115 = vmatpush.bf16.msra.mxu3 %v1741_v49  ;;  %v1566_v49 = vld [vmem:[%s2540_s7 + $0x54] sm:$0xf0] }
  0x46   :  { %1090 = vmatpush.bf16.msra.mxu0 %v1705_v53  ;;  %v1536_v53 = vld [vmem:[%s2540_s7] sm:$0xf] }
  0x47   :  { %1103 = vmatpush.bf16.msra.mxu1 %v1709_v57 }
  0x49   :  { %1116 = vmatpush.bf16.msra.mxu3 %v1713_v58  ;;  %v1569_v58 = vor.u32 %v1830_v46, %v1566_v49  ;;  %v1857_v49 = vld [vmem:[%s2540_s7 + $0x110] sm:$0xf0] }
  0x4a   :  { %1091 = vmatpush.bf16.msra.mxu0 %v1677_v1  ;;  %v1877_v1 = vld [vmem:[%s2540_s7 + $0x1b0] sm:$0xf0]  ;;  %v1673_v50 = vor.u32 %v1857_v49, %v1672_v48 }
  0x4b   :  { %1104 = vmatpush.bf16.msra.mxu1 %v1681_v4  ;;  %v1756_v4 = vld [vmem:[%s2540_s7 + $0x1a0] sm:$0xf] }
  0x4d   :  { %1117 = vmatpush.bf16.msra.mxu3 %v1685_v5  ;;  %v1878_v5 = vld [vmem:[%s2540_s7 + $0x1b8] sm:$0xf0] }
  0x9e   :  { %v471_v8 = vpop.f32.mrf.mxu0 }
  0x9f   :  { %v484_v9 = vpop.f32.mrf.mxu1  ;;  %v472_v19 = vadd.f32 %v1880_v17, %v471_v8  ;;  %v1742_v8 = vld [vmem:[%s2540_s7 + $0x1ac] sm:$0xf0]  ;;  %v1714_v17 = vld [vmem:[%s2540_s7 + $0x174] sm:$0xf0] }
  0xa1   :  { %v485_v23 = vadd.f32 %v484_v9, %v472_v19  ;;  %v1650_v9 = vld [vmem:[%s2540_s7 + $0xfc] sm:$0xf0] }
  0xa2   :  { %v1653_v18 = vor.u32 %v1851_v6, %v1650_v9  ;;  %v1602_v9 = vld [vmem:[%s2540_s7 + $0x94] sm:$0xf0] }
  0xa4   :  { %1105 = vmatpush.bf16.msra.mxu1 %v1653_v18  ;;  %v1870_v18 = vld [vmem:[%s2540_s7 + $0x178] sm:$0xf0] }
  0xa6   :  { %v473_v11 = vpop.f32.mrf.mxu0  ;;  %v497_v14 = vpop.f32.mrf.mxu2 }
  0xa7   :  { %v486_v12 = vpop.f32.mrf.mxu1  ;;  %v510_v15 = vpop.f32.mrf.mxu3  ;;  %v498_v25 = vadd.f32 %v497_v14, %v485_v23  ;;  %v1855_v11 = vld [vmem:[%s2540_s7 + $0x100] sm:$0xf0]  ;;  %v1649_v14 = vor.u32 %v1854_v3, %v1648_v2  ;;  %v1717_v23 = vor.u32 %v1866_v13, %v1714_v17  ;;  %v1874_v2 = vld [vmem:[%s2540_s7 + $0x19c] sm:$0xf]  ;;  %v1750_v3 = vld [vmem:[%s2540_s7 + $0x1b4] sm:$0xf0]  ;;  %v1749_v13 = vor.u32 %v1877_v1, %v1748_v0 }
  0xa8   :  { %v1745_v12 = vor.u32 %v1873_v7, %v1742_v8  ;;  %v1657_v19 = vor.u32 %v1855_v11, %v1656_v10  ;;  %v1537_v7 = vor.u32 %v1826_v54, %v1536_v53  ;;  %v1838_v8 = vld [vmem:[%s2540_s7 + $0x7c] sm:$0xf]  ;;  %v1541_v10 = vor.u32 %v1823_v55, %v1538_v60  ;;  %v1638_v55 = vld [vmem:[%s2540_s7 + $0xd4] sm:$0xf0]  ;;  %v1608_v60 = vld [vmem:[%s2540_s7 + $0x80] sm:$0xf] }
  0xa9   :  { %v511_v28 = vadd.f32 %v510_v15, %v498_v25  ;;  %v1620_v15 = vld [vmem:[%s2540_s7 + $0xa8] sm:$0xf]  ;;  %v1859_v25 = vld [vmem:[%s2540_s7 + $0x124] sm:$0xf]  ;;  %1092 = vmatpush.bf16.msra.mxu0 %v1649_v14  ;;  %v1545_v11 = vor.u32 %v1827_v62, %v1544_v61  ;;  %v1753_v14 = vor.u32 %v1874_v2, %v1750_v3  ;;  %v1605_v17 = vor.u32 %v1838_v8, %v1602_v9  ;;  %v1846_v53 = vld [vmem:[%s2540_s7 + $0xbc] sm:$0xf] }
  0xaa   :  { %1128 = vmatpush.bf16.msrb.mxu2 %v1745_v12  ;;  %v1621_v27 = vor.u32 %v1847_v16, %v1620_v15  ;;  %1118 = vmatpush.bf16.msra.mxu3 %v1657_v19  ;;  %v1720_v15 = vld [vmem:[%s2540_s7 + $0x160] sm:$0xf]  ;;  %v1757_v16 = vor.u32 %v1878_v5, %v1756_v4  ;;  %v1867_v19 = vld [vmem:[%s2540_s7 + $0x164] sm:$0xf]  ;;  %v1842_v61 = vld [vmem:[%s2540_s7 + $0x98] sm:$0xf0] }
  0xab   :  { %v1839_v62 = vld [vmem:[%s2540_s7 + $0x84] sm:$0xf]  ;;  %v1610_v0 = vld [vmem:[%s2540_s7 + $0x9c] sm:$0xf0]  ;;  %v1616_v1 = vld [vmem:[%s2540_s7 + $0x88] sm:$0xf] }
  0xac   :  { %v1843_v2 = vld [vmem:[%s2540_s7 + $0xa0] sm:$0xf0]  ;;  %v1613_v3 = vor.u32 %v1839_v62, %v1610_v0  ;;  %v1580_v5 = vld [vmem:[%s2540_s7 + $0x48] sm:$0xf]  ;;  %v1588_v9 = vld [vmem:[%s2540_s7 + $0x50] sm:$0xf] }
  0xad   :  { %1093 = vmatpush.bf16.msra.mxu0 %v1621_v27  ;;  %v1831_v27 = vld [vmem:[%s2540_s7 + $0x44] sm:$0xf]  ;;  %v1617_v4 = vor.u32 %v1843_v2, %v1616_v1  ;;  %v1582_v8 = vld [vmem:[%s2540_s7 + $0x64] sm:$0xf0] }
  0xae   :  { %v499_v20 = vpop.f32.mrf.mxu2  ;;  %1129 = vmatpush.bf16.msrb.mxu2 %v1717_v23 }
  0xaf   :  { %v512_v21 = vpop.f32.mrf.mxu3  ;;  %v1844_v20 = vld [vmem:[%s2540_s7 + $0xac] sm:$0xf] }
  0xb0   :  { %v1622_v21 = vld [vmem:[%s2540_s7 + $0xc4] sm:$0xf0] }
  0xb6   :  { %v549_v26 = vpop.f32.mrf.mxu2 }
  0xbe   :  { %v523_v29 = vpop.f32.mrf.mxu0  ;;  %v551_v33 = vpop.f32.mrf.mxu2 }
  0xbf   :  { %v536_v30 = vpop.f32.mrf.mxu1  ;;  %v524_v31 = vadd.f32 %v523_v29, %v511_v28  ;;  %v1592_v28 = vld [vmem:[%s2540_s7 + $0x70] sm:$0xf]  ;;  %v1840_v29 = vld [vmem:[%s2540_s7 + $0x88] sm:$0xf0]  ;;  %v1837_v33 = vld [vmem:[%s2540_s7 + $0x74] sm:$0xf] }
  0xc0   :  { %v1593_v40 = vor.u32 %v1840_v29, %v1592_v28  ;;  %v1574_v28 = vld [vmem:[%s2540_s7 + $0x5c] sm:$0xf0]  ;;  %v1692_v29 = vld [vmem:[%s2540_s7 + $0x128] sm:$0xf] }
  0xc1   :  { %v537_v32 = vadd.f32 %v536_v30, %v524_v31  ;;  %v1625_v31 = vor.u32 %v1844_v20, %v1622_v21  ;;  %v1722_v20 = vld [vmem:[%s2540_s7 + $0x17c] sm:$0xf0]  ;;  %v1728_v21 = vld [vmem:[%s2540_s7 + $0x168] sm:$0xf] }
  0xc2   :  { %1094 = vmatpush.bf16.msra.mxu0 %v1593_v40  ;;  %v1546_v40 = vld [vmem:[%s2540_s7 + $0x24] sm:$0xf0] }
  0xc3   :  { %v550_v34 = vadd.f32 %v549_v26, %v537_v32  ;;  %v1686_v26 = vld [vmem:[%s2540_s7 + $0x13c] sm:$0xf0]  ;;  %v1629_v32 = vor.u32 %v1848_v24, %v1628_v22  ;;  %1106 = vmatpush.bf16.msra.mxu1 %v1625_v31  ;;  %v1871_v22 = vld [vmem:[%s2540_s7 + $0x180] sm:$0xf0]  ;;  %v1721_v24 = vor.u32 %v1870_v18, %v1720_v15  ;;  %v1828_v15 = vld [vmem:[%s2540_s7 + $0x28] sm:$0xf0] }
  0xc4   :  { %v1689_v30 = vor.u32 %v1859_v25, %v1686_v26  ;;  %v1725_v25 = vor.u32 %v1867_v19, %v1722_v20  ;;  %v1729_v26 = vor.u32 %v1871_v22, %v1728_v21  ;;  %v1863_v31 = vld [vmem:[%s2540_s7 + $0x140] sm:$0xf0]  ;;  %v1560_v18 = vld [vmem:[%s2540_s7 + $0x18] sm:$0xf]  ;;  %v1829_v19 = vld [vmem:[%s2540_s7 + $0x30] sm:$0xf0] }
  0xc5   :  { %v553_v35 = vmax.f32 %v550_v34, 0.0  ;;  %v1852_v34 = vld [vmem:[%s2540_s7 + $0xec] sm:$0xf]  ;;  %1119 = vmatpush.bf16.msra.mxu3 %v1629_v32  ;;  %v1561_v22 = vor.u32 %v1829_v19, %v1560_v18 }
  0xc6   :  { %v525_v36 = vpop.f32.mrf.mxu0  ;;  %1130 = vmatpush.bf16.msrb.mxu2 %v1689_v30  ;;  %1095 = vmatpush.bf16.msra.mxu0 %v1565_v52  ;;  %v1577_v30 = vor.u32 %v1831_v27, %v1574_v28  ;;  %v1860_v32 = vld [vmem:[%s2540_s7 + $0x12c] sm:$0xf]  ;;  %v1849_v52 = vld [vmem:[%s2540_s7 + $0xd0] sm:$0xf0] }
  0xc7   :  { %v538_v37 = vpop.f32.mrf.mxu1  ;;  %v554_v38 = vpack.c.bf16 %v553_v35, %v553_v35  ;;  %v1658_v35 = vld [vmem:[%s2540_s7 + $0x104] sm:$0xf0]  ;;  %v1594_v36 = vld [vmem:[%s2540_s7 + $0x8c] sm:$0xf0]  ;;  %v1637_v54 = vor.u32 %v1849_v52, %v1636_v51 }
  0xc8   :  { %v1600_v37 = vld [vmem:[%s2540_s7 + $0x78] sm:$0xf]  ;;  %v1661_v43 = vor.u32 %v1852_v34, %v1658_v35  ;;  %v1597_v44 = vor.u32 %v1837_v33, %v1594_v36  ;;  %v1694_v33 = vld [vmem:[%s2540_s7 + $0x144] sm:$0xf0]  ;;  %v1693_v34 = vor.u32 %v1863_v31, %v1692_v29  ;;  %v1700_v36 = vld [vmem:[%s2540_s7 + $0x130] sm:$0xf] }
  0xc9   :  { %631 = vmatmul.bf16.vlgmr.msrb.gmra.mxu3 %v554_v38  ;;  %v1841_v38 = vld [vmem:[%s2540_s7 + $0x90] sm:$0xf0]  ;;  %v1697_v35 = vor.u32 %v1860_v32, %v1694_v33  ;;  %v785_v31 = vld [vmem:[%s2541_s8] sm:$0x7f] }
  0xca   :  { %v1601_v45 = vor.u32 %v1841_v38, %v1600_v37  ;;  %1131 = vmatpush.bf16.msrb.mxu2 %v1661_v43  ;;  %1107 = vmatpush.bf16.msra.mxu1 %v1597_v44  ;;  %v1864_v37 = vld [vmem:[%s2540_s7 + $0x148] sm:$0xf0]  ;;  %v1853_v44 = vld [vmem:[%s2540_s7 + $0xf4] sm:$0xf]  ;;  %v789_v32 = vperm.slane %v785_v31, 2  ;;  %v790_v33 = vperm.slane %v785_v31, 3 }
  0xcb   :  { %1096 = vmatpush.bf16.msra.mxu0 %v1537_v7  ;;  %v1701_v38 = vor.u32 %v1864_v37, %v1700_v36  ;;  %v1856_v43 = vld [vmem:[%s2540_s7 + $0x108] sm:$0xf0]  ;;  %v792_v48 = vperm.slane %v785_v31, 5 }
  0xcc   :  { %1120 = vmatpush.bf16.msra.mxu3 %v1601_v45  ;;  %v1666_v45 = vld [vmem:[%s2540_s7 + $0x10c] sm:$0xf0]  ;;  %v1665_v46 = vor.u32 %v1856_v43, %v1664_v41  ;;  %v1832_v7 = vld [vmem:[%s2540_s7 + $0x4c] sm:$0xf] }
  0xcd   :  { %v1669_v47 = vor.u32 %v1853_v44, %v1666_v45 }
  0xce   :  { %1132 = vmatpush.bf16.msrb.mxu2 %v1633_v56  ;;  %1108 = vmatpush.bf16.msra.mxu1 %v1569_v58  ;;  %v1644_v56 = vld [vmem:[%s2540_s7 + $0xc0] sm:$0xf]  ;;  %v1641_v58 = vor.u32 %v1846_v53, %v1638_v55 }
  0xcf   :  { %1141 = vmatpush.bf16.msrb.mxu0 %v1749_v13 }
  0xd0   :  { %1121 = vmatpush.bf16.msra.mxu3 %v1573_v59 }
  0xd2   :  { %1109 = vmatpush.bf16.msra.mxu1 %v1541_v10  ;;  %1133 = vmatpush.bf16.msrb.mxu2 %v1605_v17  ;;  %v1836_v10 = vld [vmem:[%s2540_s7 + $0x68] sm:$0xf0]  ;;  %v1554_v17 = vld [vmem:[%s2540_s7 + $0x2c] sm:$0xf0] }
  0xd3   :  { %1142 = vmatpush.bf16.msrb.mxu0 %v1721_v24  ;;  %v1589_v13 = vor.u32 %v1836_v10, %v1588_v9 }
  0xd4   :  { %1122 = vmatpush.bf16.msra.mxu3 %v1545_v11 }
  0xd6   :  { %1154 = vmatpush.bf16.msrb.mxu1 %v1753_v14  ;;  %1134 = vmatpush.bf16.msrb.mxu2 %v1577_v30  ;;  %v1552_v14 = vld [vmem:[%s2540_s7 + $0x10] sm:$0xf] }
  0xd7   :  { %1143 = vmatpush.bf16.msrb.mxu0 %v1693_v34  ;;  %v1553_v20 = vor.u32 %v1828_v15, %v1552_v14  ;;  %v787_v34 = vperm.slane %v785_v31, 0 }
  0xd8   :  { %1167 = vmatpush.bf16.msrb.mxu3 %v1757_v16  ;;  %v1825_v16 = vld [vmem:[%s2540_s7 + $0x14] sm:$0xf] }
  0xd9   :  { %v1557_v21 = vor.u32 %v1825_v16, %v1554_v17 }
  0xda   :  { %1155 = vmatpush.bf16.msrb.mxu1 %v1725_v25 }
  0xdb   :  { %1144 = vmatpush.bf16.msrb.mxu0 %v1665_v46 }
  0xdc   :  { %1168 = vmatpush.bf16.msrb.mxu3 %v1729_v26 }
  0xde   :  { %1156 = vmatpush.bf16.msrb.mxu1 %v1697_v35  ;;  %v788_v35 = vperm.slane %v785_v31, 1 }
  0xdf   :  { %1145 = vmatpush.bf16.msrb.mxu0 %v1637_v54 }
  0xe0   :  { %1169 = vmatpush.bf16.msrb.mxu3 %v1701_v38 }
  0xe2   :  { %1157 = vmatpush.bf16.msrb.mxu1 %v1669_v47  ;;  %v791_v47 = vperm.slane %v785_v31, 4 }
  0xe4   :  { %1170 = vmatpush.bf16.msrb.mxu3 %v1673_v50 }
  0xe6   :  { %1158 = vmatpush.bf16.msrb.mxu1 %v1641_v58  ;;  %v793_v58 = vperm.slane %v785_v31, 6 }
  0xea   :  { %1159 = vmatpush.bf16.msrb.mxu1 %v1613_v3 }
 0x14c   :  { %v632_v57 = vpop.f32.mrf.mxu3 }
 0x14d   :  { %v633_v63 = vadd.f32 %v1881_v39, %v632_v57  ;;  %v1824_v39 = vld [vmem:[%s2540_s7 + $0xc] sm:$0xf]  ;;  %v1850_v57 = vld [vmem:[%s2540_s7 + $0xd8] sm:$0xf0] }
 0x14e   :  { %v1549_v42 = vor.u32 %v1824_v39, %v1546_v40  ;;  %v1645_v59 = vor.u32 %v1850_v57, %v1644_v56 }
 0x14f   :  { %v636_v6 = vmax.f32 %v633_v63, 0.0  ;;  %v1609_v63 = vor.u32 %v1842_v61, %v1608_v60 }
 0x150   :  { %1135 = vmatpush.bf16.msrb.mxu2 %v1549_v42  ;;  %1171 = vmatpush.bf16.msrb.mxu3 %v1645_v59 }
 0x151   :  { %v637_v12 = vpack.c.bf16 %v636_v6, %v636_v6  ;;  %v1835_v6 = vld [vmem:[%s2540_s7 + $0x60] sm:$0xf0]  ;;  %1146 = vmatpush.bf16.msrb.mxu0 %v1609_v63 }
 0x152   :  { %v1581_v11 = vor.u32 %v1835_v6, %v1580_v5 }
 0x153   :  { %714 = vmatmul.bf16.vlgmr.msra.gmra.mxu2 %v637_v12  ;;  %v1585_v12 = vor.u32 %v1832_v7, %v1582_v8 }
 0x154   :  { %v634_v23 = vpop.f32.mrf.mxu3  ;;  %1172 = vmatpush.bf16.msrb.mxu3 %v1617_v4 }
 0x155   :  { %1147 = vmatpush.bf16.msrb.mxu0 %v1581_v11  ;;  %1160 = vmatpush.bf16.msrb.mxu1 %v1585_v12  ;;  %v1882_v23 = vld [vmem:[%s2539_s6] ss:$0 sm:$0xff]  ;;  %s1923_s6 = smov [#allocation2]  }
 0x156   :  { %s1262_s8 = sshll.u32 %s1923_s6, 4  ;;  %s1263_s8 = int_to_ptr.vmem [resolvable:$true] %s1262_s8 }
 0x158   :  { %1173 = vmatpush.bf16.msrb.mxu3 %v1589_v13 }
 0x159   :  { %1148 = vmatpush.bf16.msrb.mxu0 %v1553_v20  ;;  %1161 = vmatpush.bf16.msrb.mxu1 %v1557_v21 }
 0x15c   :  { %1174 = vmatpush.bf16.msrb.mxu3 %v1561_v22 }
 0x1d6   :  { %v715_v24 = vpop.f32.mrf.mxu2 }
 0x1d7   :  { %v716_v25 = vadd.f32 %v1882_v23, %v715_v24 }
 0x1d9   :  { %v719_v26 = vmax.f32 %v716_v25, 0.0 }
 0x1db   :  { %v720_v27 = vpack.c.bf16 %v719_v26, %v719_v26 }
 0x1dd   :  { %1097 = vmatmul.bf16.vlgmr.msra.gmra.mxu0 %v720_v27  ;;  %1110 = vmatmul.bf16.vlgmr.msra.gmra.mxu1 %v720_v27 }
 0x1de   :  { %1123 = vmatmul.bf16.vlgmr.msra.gmra.mxu3 %v720_v27  ;;  %1136 = vmatmul.bf16.vlgmr.msrb.gmra.mxu2 %v720_v27  ;;  %v717_v28 = vpop.f32.mrf.mxu2 }
 0x1ed   :  { %1149 = vmatmul.bf16.vlgmr.msrb.gmra.mxu0 %v720_v27  ;;  %1162 = vmatmul.bf16.vlgmr.msrb.gmra.mxu1 %v720_v27 }
 0x1ee   :  { %1175 = vmatmul.bf16.vlgmr.msrb.gmra.mxu3 %v720_v27 }
 0x25a   :  { %v1098_v29 = vpop.f32.mrf.mxu0  ;;  %v1111_v30 = vpop.f32.mrf.mxu1 }
 0x25b   :  { %v1099_v42 = vadd.f32 %v1098_v29, %v787_v34  ;;  %v1112_v43 = vadd.f32 %v1111_v30, %v788_v35 }
 0x25d   :  { %v1180_v46 = vmul.f32 0.5, %v1099_v42  ;;  %v1181_v49 = vmul.f32 0.5, %v1112_v43 }
 0x261   :  { %v1124_v36 = vpop.f32.mrf.mxu3  ;;  %v1137_v37 = vpop.f32.mrf.mxu2 }
 0x262   :  { %v1125_v38 = vadd.f32 %v1124_v36, %v789_v32  ;;  %v1138_v39 = vadd.f32 %v1137_v37, %v790_v33  ;;  %v1100_v40 = vpop.f32.mrf.mxu0  ;;  %v1113_v41 = vpop.f32.mrf.mxu1 }
 0x264   :  { %v1182_v44 = vmul.f32 0.5, %v1125_v38  ;;  %v1183_v45 = vmul.f32 0.5, %v1138_v39 }
 0x266   :  { %1883 = vtanh.f32 %v1182_v44 }
 0x267   :  { %1885 = vtanh.f32 %v1183_v45 }
 0x268   :  { %1887 = vtanh.f32 %v1180_v46 }
 0x269   :  { %v1126_v50 = vpop.f32.mrf.mxu3  ;;  %v1139_v51 = vpop.f32.mrf.mxu2  ;;  %1889 = vtanh.f32 %v1181_v49 }
 0x26a   :  { %v1150_v52 = vpop.f32.mrf.mxu0  ;;  %v1163_v53 = vpop.f32.mrf.mxu1 }
 0x26b   :  { %v1151_v54 = vadd.f32 %v1150_v52, %v791_v47  ;;  %v1164_v55 = vadd.f32 %v1163_v53, %v792_v48 }
 0x26c   :  { %v1884_v59 = vpop.eup %1883 }
 0x26d   :  { %v1184_v56 = vmul.f32 0.5, %v1151_v54  ;;  %v1185_v57 = vmul.f32 0.5, %v1164_v55  ;;  %v1886_v60 = vpop.eup %1885  ;;  %v1196_v3 = vadd.f32 1.0, %v1884_v59 }
 0x26e   :  { %v1888_v61 = vpop.eup %1887  ;;  %v1197_v4 = vadd.f32 1.0, %v1886_v60 }
 0x26f   :  { %1891 = vtanh.f32 %v1184_v56  ;;  %v1890_v63 = vpop.eup %1889  ;;  %v1194_v7 = vadd.f32 1.0, %v1888_v61  ;;  %v1203_v11 = vmul.f32 0.5, %v1196_v3 }
 0x270   :  { %1893 = vtanh.f32 %v1185_v57  ;;  %v1195_v8 = vadd.f32 1.0, %v1890_v63  ;;  %v1204_v12 = vmul.f32 0.5, %v1197_v4 }
 0x271   :  { %v1176_v62 = vpop.f32.mrf.mxu3  ;;  %v1201_v14 = vmul.f32 0.5, %v1194_v7 }
 0x272   :  { %v1177_v0 = vadd.f32 %v1176_v62, %v793_v58  ;;  %v1152_v1 = vpop.f32.mrf.mxu0  ;;  %v1165_v2 = vpop.f32.mrf.mxu1  ;;  %v1202_v15 = vmul.f32 0.5, %v1195_v8  ;;  %v1209_v19 = vpack.c.bf16 %v1204_v12, %v1203_v11 }
 0x274   :  { %v1186_v5 = vmul.f32 0.5, %v1177_v0  ;;  %v1208_v21 = vpack.c.bf16 %v1202_v15, %v1201_v14  ;;  %v1217_v24 = vrot.slane %v1209_v19, 6  ;;  %v1218_v25 = vrot.slane %v1209_v19, 1 }
 0x275   :  { %v1892_v6 = vpop.eup %1891 }
 0x276   :  { %v1894_v9 = vpop.eup %1893  ;;  %v1198_v10 = vadd.f32 1.0, %v1892_v6  ;;  %1895 = vtanh.f32 %v1186_v5  ;;  %v1216_v27 = vrot.slane %v1208_v21, 3  ;;  %v1230_v33 = vsel %vm1227_vm4, %v1217_v24, %v1218_v25 }
 0x277   :  { %v1199_v13 = vadd.f32 1.0, %v1894_v9 }
 0x278   :  { %v1205_v16 = vmul.f32 0.5, %v1198_v10  ;;  %v1226_v34 = vsel %vm1223_vm2, %v1208_v21, %v1216_v27 }
 0x279   :  { %v1206_v17 = vmul.f32 0.5, %v1199_v13  ;;  %v1178_v18 = vpop.f32.mrf.mxu3  ;;  %v1232_v37 = vsel %vm1231_vm11, %v1226_v34, %v1230_v33 }
 0x27b   :  { %v1210_v22 = vpack.c.bf16 %v1206_v17, %v1205_v16 }
 0x27c   :  { %v1896_v20 = vpop.eup %1895 }
 0x27d   :  { %v1200_v23 = vadd.f32 1.0, %v1896_v20  ;;  %v1219_v28 = vrot.slane %v1210_v22, 4  ;;  %v1220_v29 = vrot.slane %v1210_v22, 7 }
 0x27f   :  { %v1207_v26 = vmul.f32 0.5, %v1200_v23  ;;  %v1236_v35 = vsel %vm1233_vm8, %v1219_v28, %v1220_v29 }
 0x281   :  { %v1211_v30 = vpack.c.bf16 %v1207_v26, %v1207_v26 }
 0x283   :  { %v1221_v31 = vrot.slane %v1211_v30, 2  ;;  %v1222_v32 = vrot.slane %v1211_v30, 5 }
 0x285   :  { %v1240_v36 = vsel %vm1237_vm12, %v1221_v31, %v1222_v32 }
 0x286   :  { %v1242_v38 = vsel %vm1241_vm15, %v1236_v35, %v1240_v36 }
 0x287   :  { %v1244_v39 = vsel %vm1243_vm0, %v1232_v37, %v1242_v38 }
 0x288   :  { %1256 = vst.msk [vmem:[#allocation2] sm:$0x7f] %vm1255_vm1, %v1244_v39 }
 0x289   :  { %1267 = dma.vmem_to_hbm [thread:$0]  %s1263_s8, 112, %s1265_s4, [#allocation3]  }
 0x28a   :  { %1921 = dma.done.wait [#allocation3], 112  }
 0x28b   :  { %1922 = vsyncadd [#allocation3], 4294967184 }
 0x28c   :  { %1272 = vsyncpa [#allocation3], 1 }

</bundles_post_ra>
